<compile_context>
chip_gen: v7x
topology: tpu7x:2x2x1
jax: 0.10.0
libtpu: 0.0.40
codegen_flags: <defaults>
</compile_context>

<pallas_src>
import functools

import jax
import jax.numpy as jnp
from jax.experimental import pallas as pl
from jax.experimental.pallas import tpu as pltpu


# --------------------------------------------------------------------------
# Kernels
# --------------------------------------------------------------------------
def _rope_lane_dense_kernel(scale_ref, offset_ref, cos_ref, sin_ref, *,
                            block_rows, fold):
    """Full-width (lane-dense) cos/sin cache.

    scale_ref  : (1, W) f32   scale[c]  = inv_freq[(c % dim) % (dim//2)]   (pre-duplicated/tiled)
    offset_ref : (1, W) f32   offset[c] = c // dim   (which folded row this lane belongs to)
    cos_ref    : (block_rows, W) out dtype
    sin_ref    : (block_rows, W) out dtype

    For output row r (folded row index) and lane c, the sequence position is
      t = r * fold + offset[c]
    and the stored value is cos/sin(t * scale[c]).
    """
    w = scale_ref.shape[1]
    row0 = pl.program_id(0) * block_rows

    r = jax.lax.broadcasted_iota(jnp.int32, (block_rows, w), 0) + row0
    t = (r * fold).astype(jnp.float32) + offset_ref[...]
    freqs = t * scale_ref[...]                     # VPU broadcast multiply

    cos_ref[...] = jnp.cos(freqs).astype(cos_ref.dtype)
    sin_ref[...] = jnp.sin(freqs).astype(sin_ref.dtype)


def _rope_half_kernel(inv_freq_ref, cos_ref, sin_ref, *, block_rows):
    """Half-width path for dim % 256 == 0: one cos/sin per unique frequency,
    two lane-aligned half-writes (half is a multiple of 128)."""
    half = inv_freq_ref.shape[1]
    row0 = pl.program_id(0) * block_rows

    r = jax.lax.broadcasted_iota(jnp.int32, (block_rows, half), 0) + row0
    freqs = r.astype(jnp.float32) * inv_freq_ref[...]

    c = jnp.cos(freqs).astype(cos_ref.dtype)
    s = jnp.sin(freqs).astype(sin_ref.dtype)
    cos_ref[:, :half] = c
    cos_ref[:, half:] = c
    sin_ref[:, :half] = s
    sin_ref[:, half:] = s


# --------------------------------------------------------------------------
# Tiling policy
# --------------------------------------------------------------------------
def _pick_block_rows(num_rows, width):
    """Rows per grid step: as large as safely fits VMEM, but at least 2 grid
    steps for non-tiny problems so both v7x TensorCores get work."""
    # 2 outputs x 2 pipeline buffers x block_rows x width x 4 B  <= ~8 MiB,
    # comfortably under the scoped-VMEM default on v5e/v6e/v7x.
    vmem_rows = (8 * 1024 * 1024) // (2 * 2 * 4 * width)
    cap = max(8, (min(2048, vmem_rows) // 8) * 8)
    if num_rows <= 512:
        return num_rows                       # tiny: single block, full shape
    two_way = -(-num_rows // 2)               # >= 2 grid iterations
    block = min(cap, two_way)
    return max(8, (block // 8) * 8)           # sublane-aligned block rows


# --------------------------------------------------------------------------
# Wrapper
# --------------------------------------------------------------------------
def rotary_embedding_cache(dim, seq_len, base=10000.0, out_dtype=jnp.float32):
    """Returns (cos, sin), each (seq_len, 1, dim). out_dtype defaults to f32
    to match the torch module's default precision branch."""
    assert dim % 2 == 0
    half = dim // 2

    # Buffer init (glue, plain JAX) — matches torch init exactly.
    inv_freq = 1.0 / (base ** (jnp.arange(0, dim, 2, dtype=jnp.float32) / dim))

    # ---------------- dim % 256 == 0: aligned half-width path -------------
    if dim % 256 == 0:
        num_rows = seq_len
        block_rows = _pick_block_rows(num_rows, dim)
        grid = (pl.cdiv(num_rows, block_rows),)
        kernel = functools.partial(_rope_half_kernel, block_rows=block_rows)
        cos, sin = pl.pallas_call(
            kernel,
            out_shape=(
                jax.ShapeDtypeStruct((num_rows, dim), out_dtype),
                jax.ShapeDtypeStruct((num_rows, dim), out_dtype),
            ),
            grid_spec=pltpu.PrefetchScalarGridSpec(
                num_scalar_prefetch=0,
                grid=grid,
                in_specs=[pl.BlockSpec((1, half), lambda i: (0, 0))],
                out_specs=(
                    pl.BlockSpec((block_rows, dim), lambda i: (i, 0)),
                    pl.BlockSpec((block_rows, dim), lambda i: (i, 0)),
                ),
            ),
            compiler_params=pltpu.CompilerParams(
                dimension_semantics=("parallel",)),
        )(inv_freq.reshape(1, half))
        return cos[:, None, :], sin[:, None, :]

    # ---------------- lane-dense path (dim < 256) --------------------------
    # Duplicated inv_freq table over full dim (emb = cat([freqs, freqs])).
    inv_freq_full = jnp.concatenate([inv_freq, inv_freq])        # (dim,)

    if dim < 128 and 128 % dim == 0:
        fold = 128 // dim           # fold K sequence rows into the lane axis
    else:
        fold = 1
    width = fold * dim
    num_rows = -(-seq_len // fold)  # cdiv: folded output rows

    scale = jnp.tile(inv_freq_full, fold).reshape(1, width)
    offset = jnp.repeat(jnp.arange(fold, dtype=jnp.float32), dim).reshape(1, width)

    block_rows = _pick_block_rows(num_rows, width)
    grid = (pl.cdiv(num_rows, block_rows),)
    kernel = functools.partial(_rope_lane_dense_kernel,
                               block_rows=block_rows, fold=fold)
    cos, sin = pl.pallas_call(
        kernel,
        out_shape=(
            jax.ShapeDtypeStruct((num_rows, width), out_dtype),
            jax.ShapeDtypeStruct((num_rows, width), out_dtype),
        ),
        grid_spec=pltpu.PrefetchScalarGridSpec(
            num_scalar_prefetch=0,
            grid=grid,
            in_specs=[
                pl.BlockSpec((1, width), lambda i: (0, 0)),
                pl.BlockSpec((1, width), lambda i: (0, 0)),
            ],
            out_specs=(
                pl.BlockSpec((block_rows, width), lambda i: (i, 0)),
                pl.BlockSpec((block_rows, width), lambda i: (i, 0)),
            ),
        ),
        compiler_params=pltpu.CompilerParams(
            dimension_semantics=("parallel",)),
    )(scale, offset)

    # (num_rows, fold*dim) is the contiguous slab of (num_rows*fold, dim):
    # element [i, k*dim + j] is sequence position i*fold + k, feature j.
    cos = cos.reshape(num_rows * fold, dim)[:seq_len]
    sin = sin.reshape(num_rows * fold, dim)[:seq_len]
    return cos[:, None, :], sin[:, None, :]


def rotary_embedding_forward(x, seq_dim=1, seq_len=None, dim=None, base=10000.0):
    """Mirrors RotaryEmbedding.forward(x): seq_len taken from x.shape[seq_dim]."""
    if seq_len is None:
        seq_len = x.shape[seq_dim]
    if dim is None:
        dim = x.shape[-1]
    # NOTE: positions are f32 (like the torch reference); precision of cos/sin
    # of very large positions degrades identically to the reference.
    return rotary_embedding_cache(dim, seq_len, base=base)


# --------------------------------------------------------------------------
# Pure-JAX reference and test
# --------------------------------------------------------------------------
def _reference(dim, seq_len, base=10000.0):
    inv_freq = 1.0 / (base ** (jnp.arange(0, dim, 2, dtype=jnp.float32) / dim))
    t = jnp.arange(seq_len, dtype=jnp.float32)
    freqs = jnp.einsum("i,j->ij", t, inv_freq)
    emb = jnp.concatenate([freqs, freqs], axis=-1)
    return jnp.cos(emb)[:, None, :], jnp.sin(emb)[:, None, :]


if __name__ == "__main__":
    # Small shapes consistent with the module: x is (batch, seq, heads, head_dim)
    batch, seq, heads, head_dim = 2, 8, 4, 32
    x = jax.random.normal(jax.random.PRNGKey(0), (batch, seq, heads, head_dim),
                          dtype=jnp.float32)

    cos, sin = rotary_embedding_forward(x, seq_dim=1)
    jax.block_until_ready((cos, sin))

    cos_ref, sin_ref = _reference(head_dim, seq)
    assert cos.shape == (seq, 1, head_dim) and sin.shape == (seq, 1, head_dim)
    assert cos.dtype == jnp.float32 and sin.dtype == jnp.float32
    assert jnp.allclose(cos, cos_ref, atol=1e-5, rtol=1e-5)
    assert jnp.allclose(sin, sin_ref, atol=1e-5, rtol=1e-5)

    # Extra coverage: folded path with non-multiple seq, dim=64/128 lane-dense,
    # dim=256 half-width path, and a larger seq exercising grid>1 with a
    # clipped partial last block.
    for d, s in ((32, 7), (64, 10), (128, 24), (256, 16), (128, 1000)):
        c, sn = rotary_embedding_cache(d, s)
        jax.block_until_ready((c, sn))
        cr, sr = _reference(d, s)
        assert c.shape == (s, 1, d) and sn.shape == (s, 1, d), (d, s)
        assert jnp.allclose(c, cr, atol=1e-5, rtol=1e-5), (d, s)
        assert jnp.allclose(sn, sr, atol=1e-5, rtol=1e-5), (d, s)

    print("KERNEL_OK")
</pallas_src>

<mosaic_0001>
module attributes {stable_mosaic.version = 11 : i64} {
  func.func @_rope_lane_dense_kernel(%arg0: i32, %arg1: memref<1x128xf32, #tpu.memory_space<vmem>>, %arg2: memref<1x128xf32, #tpu.memory_space<vmem>>, %arg3: memref<2x128xf32, #tpu.memory_space<vmem>>, %arg4: memref<2x128xf32, #tpu.memory_space<vmem>>) attributes {dimension_semantics = [#tpu.dimension_semantics<parallel>], iteration_bounds = array<i64: 1>, scalar_prefetch = 0 : i64, scratch_operands = 0 : i64, tpu.core_type = #tpu.core_type<tc>, window_params = [{pipeline_mode = #tpu.pipeline_mode<synchronous>, transform_indices = @transform_0, window_bounds = array<i64: 1, 128>}, {pipeline_mode = #tpu.pipeline_mode<synchronous>, transform_indices = @transform_1, window_bounds = array<i64: 1, 128>}, {transform_indices = @transform_2, window_bounds = array<i64: 2, 128>}, {transform_indices = @transform_3, window_bounds = array<i64: 2, 128>}]} {
    %c2_i32 = arith.constant 2 : i32
    %0 = arith.muli %arg0, %c2_i32 : i32
    %1 = tpu.iota {dimensions = array<i32: 0>} : vector<2x128xi32>
    %2 = vector.broadcast %0 : i32 to vector<2x128xi32>
    %3 = arith.addi %1, %2 : vector<2x128xi32>
    %c4_i32 = arith.constant 4 : i32
    %4 = vector.broadcast %c4_i32 : i32 to vector<2x128xi32>
    %5 = arith.muli %3, %4 : vector<2x128xi32>
    %6 = arith.sitofp %5 : vector<2x128xi32> to vector<2x128xf32>
    %c0 = arith.constant 0 : index
    %c0_0 = arith.constant 0 : index
    %7 = vector.load %arg2[%c0, %c0_0] : memref<1x128xf32, #tpu.memory_space<vmem>>, vector<1x128xf32>
    %8 = vector.broadcast %7 : vector<1x128xf32> to vector<2x128xf32>
    %9 = arith.addf %6, %8 : vector<2x128xf32>
    %c0_1 = arith.constant 0 : index
    %c0_2 = arith.constant 0 : index
    %10 = vector.load %arg1[%c0_1, %c0_2] : memref<1x128xf32, #tpu.memory_space<vmem>>, vector<1x128xf32>
    %11 = vector.broadcast %10 : vector<1x128xf32> to vector<2x128xf32>
    %12 = arith.mulf %9, %11 : vector<2x128xf32>
    %13 = math.cos %12 : vector<2x128xf32>
    %c0_3 = arith.constant 0 : index
    %c0_4 = arith.constant 0 : index
    %14 = vector.load %arg3[%c0_3, %c0_4] : memref<2x128xf32, #tpu.memory_space<vmem>>, vector<2x128xf32>
    tpu.vector_store %arg3[%c0_3, %c0_4], %13 {strides = array<i32>} : memref<2x128xf32, #tpu.memory_space<vmem>>, vector<2x128xf32>,
    %15 = math.sin %12 : vector<2x128xf32>
    %c0_5 = arith.constant 0 : index
    %c0_6 = arith.constant 0 : index
    %16 = vector.load %arg4[%c0_5, %c0_6] : memref<2x128xf32, #tpu.memory_space<vmem>>, vector<2x128xf32>
    tpu.vector_store %arg4[%c0_5, %c0_6], %15 {strides = array<i32>} : memref<2x128xf32, #tpu.memory_space<vmem>>, vector<2x128xf32>,
    return
  }
  func.func @transform_0(%arg0: i32) -> (i32, i32) {
    %c0_i32 = arith.constant 0 : i32
    %c0_i32_0 = arith.constant 0 : i32
    %c0_i32_1 = arith.constant 0 : i32
    return %c0_i32, %c0_i32_0 : i32, i32
  }
  func.func @transform_1(%arg0: i32) -> (i32, i32) {
    %c0_i32 = arith.constant 0 : i32
    %c0_i32_0 = arith.constant 0 : i32
    %c0_i32_1 = arith.constant 0 : i32
    return %c0_i32, %c0_i32_0 : i32, i32
  }
  func.func @transform_2(%arg0: i32) -> (i32, i32) {
    %c0_i32 = arith.constant 0 : i32
    %c0_i32_0 = arith.constant 0 : i32
    return %arg0, %c0_i32 : i32, i32
  }
  func.func @transform_3(%arg0: i32) -> (i32, i32) {
    %c0_i32 = arith.constant 0 : i32
    %c0_i32_0 = arith.constant 0 : i32
    return %arg0, %c0_i32 : i32, i32
  }
}

</mosaic_0001>

<bundles_post_ra>
// kernel: tpu_custom_call.1
= control target key start
LH: loop header
LB: loop body
LE: loop exit
PB: predicated region body
PF: predicated region fallthrough
CT: control target
= control target key end

     0   :  { %9 = vsyncpa [#allocation3], 0  ;;  %s476_s0 = inlined_call_operand.hbm [shape: f32[1,128], index: 0, kind: input, shape index: {}]   ;;  %s477_s1 = inlined_call_operand.vmem [shape: f32[1,128], index: 1, kind: input, shape index: {}]   ;;  %s478_s2 = inlined_call_operand.hbm [shape: f32[2,128], index: 2, kind: output, shape index: {0}]   ;;  %s479_s3 = inlined_call_operand.hbm [shape: f32[2,128], index: 3, kind: output, shape index: {1}]  }
   0x1   :  { %10 = vsyncpa [#allocation4], 0 }
   0x2   :  { %11 = vsyncpa [#allocation7], 0  ;;  %s387_s12 = smov [#allocation2]   ;;  %s315_s16 = scalar_lea.hbm %s476_s0, 16 }
   0x3   :  { %s18_s13 = sshll.u32 %s387_s12, 4  ;;  %p316_p0 = scmp.ne.s32.totalorder %s476_s0, %s315_s16  ;;  %s19_s13 = int_to_ptr.vmem [resolvable:$true] %s18_s13 }
   0x4   :  { %p319_p1 = scmp.lt.u32.totalorder %s315_s16, %s476_s0 }
   0x6   :  { %p321_p2 = pnand %p319_p1, %p316_p0 }
   0x8   :  { %324 = shalt.err (!%p321_p2)
}
   0x9   :  { %s325_s21 = scalar_lea.vmem %s19_s13, 16  ;;  %s329_s22 = scalar_lea.vmem %s19_s13, 32 }
   0xa   :  { %p326_p3 = scmp.ne.s32.totalorder %s19_s13, %s325_s21  ;;  %p330_p4 = scmp.lt.s32.totalorder %s19_s13, %s19_s13 }
   0xb   :  { %p331_p5 = scmp.lt.s32.totalorder %s329_s22, %s325_s21 }
   0xd   :  { %p332_p6 = por %p331_p5, %p330_p4 }
   0xf   :  { %p333_p7 = pnand %p332_p6, %p326_p3 }
  0x11   :  { %336 = shalt.err (!%p333_p7)
}
  0x12   :  { %21 = dma.hbm_to_vmem [thread:$0]  %s476_s0, 16, %s19_s13, [#allocation3]  }
  0x13   :  { %381 = dma.done.wait [#allocation3], 16  }
  0x14   :  { %382 = vsyncadd [#allocation3], 4294967280  ;;  %v28_v0 = vlaneseq  ;;  %v288_v4 = vld [vmem:[%s477_s1] ss:$0 sm:$0xff]  ;;  %v388_v19 = vmov 683565275  }
  0x15   :  { %v289_v5 = vld [vmem:[#allocation2] ss:$0 sm:$0xff]  ;;  %v389_v21 = vmov 2475754826   ;;  %v390_v23 = vmov 2131351028  }
  0x16   :  { %v29_v1 = vshrl.u32 %v28_v0, 7  ;;  %v391_v25 = vmov 2102212464   ;;  %v392_v27 = vmov 920167782   ;;  %s394_s0 = smov [#allocation5]  }
  0x17   :  { %v393_v34 = vmov 1326507024   ;;  %s265_s1 = sshll.u32 %s394_s0, 4  ;;  %s395_s27 = smov [#allocation6]   ;;  %s266_s1 = int_to_ptr.vmem [resolvable:$true] %s265_s1 }
  0x18   :  { %v32_v2 = vmul.u32 4, %v29_v1  ;;  %s275_s28 = sshll.u32 %s395_s27, 4  ;;  %s337_s29 = scalar_lea.vmem %s266_s1, 32  ;;  %s276_s28 = int_to_ptr.vmem [resolvable:$true] %s275_s28 }
  0x19   :  { %p338_p8 = scmp.ne.s32.totalorder %s266_s1, %s337_s29  ;;  %p342_p9 = scmp.lt.s32.totalorder %s266_s1, %s266_s1 }
  0x1a   :  { %v33_v3 = vcvt.s32.f32 %v32_v2  ;;  %p343_p10 = scmp.lt.s32.totalorder %s337_s29, %s337_s29 }
  0x1c   :  { %v41_v6 = vadd.f32 %v288_v4, %v33_v3  ;;  %p344_p11 = por %p343_p10, %p342_p9 }
  0x1e   :  { %v431_v7 = vmul.f32 %v289_v5, %v41_v6  ;;  %p345_p12 = pnand %p344_p11, %p338_p8 }
  0x20   :  { %v53_v8 = vand.u32 2139095040, %v431_v7  ;;  %v50_v10 = vand.u32 2147483647, %v431_v7  ;;  %vm52_vm7 = vcmp.lt.s32.totalorder %v431_v7, 0  ;;  %vm142_vm15 = vweird.f32 %v431_v7 }
  0x22   :  { %v54_v9 = vshrl.u32 %v53_v8, 23  ;;  %v57_v13 = vand.u32 8388607, %v50_v10  ;;  %vm51_vm8 = vcmp.le.f32.partialorder %v50_v10, 0.7853982 }
  0x24   :  { %v290_v11 = vadd.s32 4294967169, %v54_v9  ;;  %v58_v16 = vor.u32 8388608, %v57_v13 }
  0x26   :  { %v60_v12 = vadd.s32 1, %v290_v11  ;;  %v98_v36 = vshll.u32 %v58_v16, 8 }
  0x28   :  { %vm61_vm0 = vcmp.gt.s32.totalorder %v60_v12, 0 }
  0x29   :  { %v62_v14 = vsel %vm61_vm0, %v60_v12, 0 }
  0x2a   :  { %v64_v15 = vand.u32 31, %v62_v14  ;;  %v63_v17 = vshrl.u32 %v62_v14, 5 }
  0x2c   :  { %v65_v18 = vsub.s32 32, %v64_v15  ;;  %v67_v20 = vshll.u32 %v388_v19, %v64_v15  ;;  %v70_v22 = vshll.u32 %v389_v21, %v64_v15  ;;  %v73_v24 = vshll.u32 %v390_v23, %v64_v15 }
  0x2d   :  { %v76_v26 = vshll.u32 %v391_v25, %v64_v15  ;;  %v79_v28 = vshll.u32 %v392_v27, %v64_v15  ;;  %vm82_vm1 = vcmp.lt.s32.totalorder %v63_v17, 1  ;;  %vm85_vm2 = vcmp.lt.s32.totalorder %v63_v17, 4 }
  0x2e   :  { %v66_v29 = vshrl.u32 %v388_v19, %v65_v18  ;;  %v68_v30 = vshrl.u32 %v389_v21, %v65_v18  ;;  %v71_v31 = vshrl.u32 %v390_v23, %v65_v18  ;;  %v74_v32 = vshrl.u32 %v391_v25, %v65_v18 }
  0x2f   :  { %v77_v33 = vshrl.u32 %v392_v27, %v65_v18  ;;  %v80_v35 = vshrl.u32 %v393_v34, %v65_v18  ;;  %vm83_vm3 = vcmp.lt.s32.totalorder %v63_v17, 2  ;;  %vm84_vm4 = vcmp.lt.s32.totalorder %v63_v17, 3 }
  0x30   :  { %v69_v37 = vor.u32 %v68_v30, %v67_v20  ;;  %v72_v38 = vor.u32 %v71_v31, %v70_v22  ;;  %v75_v39 = vor.u32 %v74_v32, %v73_v24 }
  0x31   :  { %v78_v40 = vor.u32 %v77_v33, %v76_v26  ;;  %v81_v41 = vor.u32 %v80_v35, %v79_v28 }
  0x32   :  { %v86_v42 = vsel %vm82_vm1, %v66_v29, %v69_v37  ;;  %v87_v43 = vsel %vm85_vm2, %v75_v39, 2102212464  ;;  %v90_v44 = vsel %vm82_vm1, %v69_v37, %v72_v38  ;;  %v94_v45 = vsel %vm82_vm1, %v72_v38, %v75_v39 }
  0x33   :  { %v88_v46 = vsel %vm84_vm4, %v72_v38, %v87_v43  ;;  %v91_v47 = vsel %vm85_vm2, %v78_v40, 920167782  ;;  %v95_v48 = vsel %vm85_vm2, %v81_v41, 1326507024 }
  0x34   :  { %v92_v49 = vsel %vm84_vm4, %v75_v39, %v91_v47  ;;  %v96_v50 = vsel %vm84_vm4, %v78_v40, %v95_v48  ;;  %v89_v51 = vsel %vm83_vm3, %v86_v42, %v88_v46 }
  0x35   :  { %v93_v52 = vsel %vm83_vm3, %v90_v44, %v92_v49  ;;  %v97_v53 = vsel %vm83_vm3, %v94_v45, %v96_v50  ;;  %v105_v58 = vmul.u32 %v98_v36, %v89_v51 }
  0x36   :  { %v437_v54 = vmul.u32.u64.low %v98_v36, %v97_v53  ;;  %v438_v55 = vmul.u32.u64.high %v98_v36, %v97_v53, %v437_v54  ;;  %v440_v56 = vmul.u32.u64.low %v98_v36, %v93_v52  ;;  %v441_v57 = vmul.u32.u64.high %v98_v36, %v93_v52, %v440_v56 }
  0x38   :  { %vm107_vm5 = vc.u32 %v438_v55, %v440_v56  ;;  %v108_v59 = vadd.s32 1, %v441_v57  ;;  %v106_v6 = vadd.s32 %v440_v56, %v438_v55 }
  0x3a   :  { %v109_v60 = vsel %vm107_vm5, %v108_v59, %v441_v57 }
  0x3b   :  { %v110_v61 = vadd.s32 %v109_v60, %v105_v58 }
  0x3d   :  { %v111_v62 = vadd.s32 536870912, %v110_v61 }
  0x3f   :  { %v112_v63 = vshrl.u32 %v111_v62, 30 }
  0x41   :  { %v113_v0 = vshll.u32 %v112_v63, 30  ;;  %v136_v20 = vsub.s32 4, %v112_v63 }
  0x43   :  { %v114_v1 = vsub.s32 %v110_v61, %v113_v0  ;;  %v137_v23 = vsel %vm52_vm7, %v136_v20, %v112_v63 }
  0x44   :  { %v139_v26 = vsel %vm51_vm8, 0, %v137_v23 }
  0x45   :  { %v116_v2 = vsub.s32 0, %v114_v1  ;;  %v247_v27 = vadd.s32 3, %v139_v26  ;;  %v143_v28 = vand.u32 3, %v139_v26 }
  0x47   :  { %v291_v3 = vmin.u32 %v116_v2, %v114_v1  ;;  %v248_v29 = vand.u32 3, %v247_v27  ;;  %vm148_vm9 = vcmp.eq.s32.totalorder %v143_v28, 2  ;;  %vm145_vm11 = vcmp.eq.s32.totalorder %v143_v28, 0 }
  0x48   :  { %vm144_vm13 = vcmp.lt.s32.totalorder %v143_v28, 2 }
  0x49   :  { %v118_v4 = vclz %v291_v3  ;;  %vm253_vm10 = vcmp.eq.s32.totalorder %v248_v29, 2  ;;  %vm250_vm12 = vcmp.eq.s32.totalorder %v248_v29, 0  ;;  %vm249_vm14 = vcmp.lt.s32.totalorder %v248_v29, 2 }
  0x4b   :  { %v292_v5 = vadd.s32 4294967294, %v118_v4 }
  0x4d   :  { %vm293_vm6 = vcmp.lt.s32.totalorder %v292_v5, 0 }
  0x4e   :  { %v121_v8 = vsel %vm293_vm6, 0, %v292_v5 }
  0x4f   :  { %v122_v9 = vsub.s32 32, %v121_v8  ;;  %v123_v11 = vshll.u32 %v114_v1, %v121_v8  ;;  %v126_v12 = vsub.s32 4294967266, %v121_v8 }
  0x51   :  { %v124_v13 = vshrl.u32 %v106_v6, %v122_v9  ;;  %v127_v14 = vadd.s32 127, %v126_v12 }
  0x53   :  { %v125_v15 = vor.u32 %v124_v13, %v123_v11  ;;  %v128_v16 = vshll.u32 %v127_v14, 23 }
  0x55   :  { %v129_v17 = vor.u32 4788187, %v128_v16  ;;  %v132_v18 = vcvt.s32.f32 %v125_v15 }
  0x57   :  { %v130_v19 = vand.u32 2147483647, %v129_v17 }
  0x59   :  { %v133_v21 = vmul.f32 %v132_v18, %v130_v19 }
  0x5b   :  { %v134_v22 = vxor.u32 2147483648, %v133_v21 }
  0x5d   :  { %v135_v24 = vsel %vm52_vm7, %v134_v22, %v133_v21 }
  0x5e   :  { %v138_v25 = vsel %vm51_vm8, %v431_v7, %v135_v24 }
  0x5f   :  { %311 = vcosq.f32 %v138_v25 }
  0x60   :  { %313 = vsinq.f32 %v138_v25 }
  0x69   :  { %v312_v30 = vpop.eup %311 }
  0x6a   :  { %v314_v31 = vpop.eup %313  ;;  %v149_v32 = vxor.u32 2147483648, %v312_v30 }
  0x6b   :  { %v146_v10 = vxor.u32 2147483648, %v314_v31 }
  0x6c   :  { %v150_v33 = vsel %vm148_vm9, %v149_v32, %v314_v31  ;;  %v255_v34 = vsel %vm253_vm10, %v149_v32, %v314_v31 }
  0x6d   :  { %v147_v35 = vsel %vm145_vm11, %v312_v30, %v146_v10  ;;  %v252_v36 = vsel %vm250_vm12, %v312_v30, %v146_v10 }
  0x6e   :  { %v151_v37 = vsel %vm144_vm13, %v147_v35, %v150_v33  ;;  %v256_v38 = vsel %vm249_vm14, %v252_v36, %v255_v34 }
  0x6f   :  { %v152_v39 = vsel %vm142_vm15, nan, %v151_v37  ;;  %v257_v40 = vsel %vm142_vm15, nan, %v256_v38 }
  0x70   :  { %153 = vst [vmem:[#allocation5] sm:$0x3] %v152_v39  ;;  %258 = vst [vmem:[#allocation6] sm:$0x3] %v257_v40 }
  0x71   :  { %348 = shalt.err (!%p345_p12)
}
  0x72   :  { %s349_s5 = scalar_lea.hbm %s478_s2, 32 }
  0x73   :  { %p350_p13 = scmp.ne.s32.totalorder %s478_s2, %s349_s5  ;;  %p353_p0 = scmp.lt.u32.totalorder %s349_s5, %s478_s2 }
  0x75   :  { %p355_p1 = pnand %p353_p0, %p350_p13 }
  0x77   :  { %358 = shalt.err (!%p355_p1)
}
  0x78   :  { %268 = dma.vmem_to_hbm [thread:$0]  %s266_s1, 32, %s478_s2, [#allocation4]  }
  0x79   :  { %s359_s12 = scalar_lea.vmem %s276_s28, 32  ;;  %p364_p3 = scmp.lt.s32.totalorder %s276_s28, %s276_s28 }
  0x7a   :  { %p360_p2 = scmp.ne.s32.totalorder %s276_s28, %s359_s12  ;;  %p365_p4 = scmp.lt.s32.totalorder %s359_s12, %s359_s12 }
  0x7c   :  { %p366_p5 = por %p365_p4, %p364_p3 }
  0x7e   :  { %p367_p6 = pnand %p366_p5, %p360_p2 }
  0x80   :  { %370 = shalt.err (!%p367_p6)
}
  0x81   :  { %s371_s15 = scalar_lea.hbm %s479_s3, 32 }
  0x82   :  { %p372_p7 = scmp.ne.s32.totalorder %s479_s3, %s371_s15  ;;  %p375_p8 = scmp.lt.u32.totalorder %s371_s15, %s479_s3 }
  0x84   :  { %p377_p9 = pnand %p375_p8, %p372_p7 }
  0x86   :  { %380 = shalt.err (!%p377_p9)
}
  0x87   :  { %278 = dma.vmem_to_hbm [thread:$0]  %s276_s28, 32, %s479_s3, [#allocation7]  }
  0x88   :  { %383 = dma.done.wait [#allocation4], 32  }
  0x89   :  { %384 = vsyncadd [#allocation4], 4294967264 }
  0x8a   :  { %385 = dma.done.wait [#allocation7], 32  }
  0x8b   :  { %386 = vsyncadd [#allocation7], 4294967264 }
  0x8c   :  { %285 = vsyncpa [#allocation3], 1 }
  0x8d   :  { %286 = vsyncpa [#allocation4], 1 }
  0x8e   :  { %287 = vsyncpa [#allocation7], 1 }

</bundles_post_ra>
